<compile_context>
chip_gen: v6e
topology: v6e:2x2x1
jax: 0.10.0
libtpu: 0.0.40
codegen_flags: <defaults>
</compile_context>

<pallas_src>
import jax
import jax.numpy as jnp
from jax.experimental import pallas as pl
from jax.experimental.pallas import tpu as pltpu


def _round_up(x, m):
    return (x + m - 1) // m * m


def expert_kernel(x_ref, w1_ref, b1_ref, w2_ref, b2_ref, o_ref, acc_ref):
    # x_ref : (tm, Dp) bf16   w1_ref: (Dp, th) bf16   b1_ref: (1, th) f32
    # w2_ref: (th, Dp) bf16   b2_ref: (1, Dp)  f32
    # o_ref : (tm, Dp) f32    acc_ref: (tm, Dp) f32 scratch (resident over h)
    h = pl.program_id(1)

    @pl.when(h == 0)
    def _():
        acc_ref[...] = jnp.zeros_like(acc_ref)

    # Linear 1 on the MXU (f32 accumulation), bias + ReLU in f32 vregs.
    pre = jnp.dot(x_ref[...], w1_ref[...],
                  preferred_element_type=jnp.float32) + b1_ref[...]
    act = jnp.maximum(pre, 0.0)

    # Linear 2 partial sum for this hidden-dim tile.
    acc_ref[...] += jnp.dot(act.astype(w2_ref.dtype), w2_ref[...],
                            preferred_element_type=jnp.float32)

    @pl.when(h == pl.num_programs(1) - 1)
    def _():
        # Dropout == identity (eval mode).
        o_ref[...] = (acc_ref[...] + b2_ref[...]).astype(o_ref.dtype)


def expert_forward(x, w1, b1, w2, b2, *, tm=256, th=512, mxu_dtype=jnp.bfloat16):
    """x: (M, D) f32.  w1: (D, H), b1: (H,), w2: (H, D), b2: (D,).  Returns (M, D) f32."""
    M, D = x.shape
    H = w1.shape[1]

    # Lane-dense padding of feature dims to multiples of 128; clamp tiles for tiny inputs.
    Dp = _round_up(D, 128)
    tm = min(tm, _round_up(M, 128))
    Mp = _round_up(M, tm)
    th = min(th, _round_up(H, 128))
    Hp = _round_up(H, th)

    # Zero-padding is exact: padded x cols / W1 rows are 0, padded hidden units get
    # pre-activation 0 -> relu 0 -> multiplied by zero W2 rows; padded out cols sliced off.
    x_p = jnp.zeros((Mp, Dp), mxu_dtype).at[:M, :D].set(x.astype(mxu_dtype))
    w1_p = jnp.zeros((Dp, Hp), mxu_dtype).at[:D, :H].set(w1.astype(mxu_dtype))
    w2_p = jnp.zeros((Hp, Dp), mxu_dtype).at[:H, :D].set(w2.astype(mxu_dtype))
    b1_p = jnp.zeros((1, Hp), jnp.float32).at[0, :H].set(b1.astype(jnp.float32))
    b2_p = jnp.zeros((1, Dp), jnp.float32).at[0, :D].set(b2.astype(jnp.float32))

    grid = (Mp // tm, Hp // th)

    # Explicit VMEM budget: double-buffered inputs/outputs + f32 accumulator + headroom.
    bpe = jnp.dtype(mxu_dtype).itemsize
    tile_bytes = (tm * Dp * bpe          # x tile
                  + Dp * th * bpe        # W1 tile
                  + th * Dp * bpe        # W2 tile
                  + th * 4 + Dp * 4      # biases
                  + tm * Dp * 4)         # output tile
    vmem_bytes = int(min(2 * tile_bytes + tm * Dp * 4 + (8 << 20), 100 << 20))

    cost = pl.CostEstimate(
        flops=4 * Mp * Dp * Hp,
        transcendentals=0,
        bytes_accessed=(x_p.size * bpe + w1_p.size * bpe + w2_p.size * bpe
                        + b1_p.size * 4 + b2_p.size * 4 + Mp * Dp * 4),
    )

    out_p = pl.pallas_call(
        expert_kernel,
        out_shape=jax.ShapeDtypeStruct((Mp, Dp), jnp.float32),
        grid_spec=pltpu.PrefetchScalarGridSpec(
            num_scalar_prefetch=0,
            grid=grid,
            in_specs=[
                pl.BlockSpec((tm, Dp), lambda i, h: (i, 0)),   # x tile
                pl.BlockSpec((Dp, th), lambda i, h: (0, h)),   # W1 tile over H
                pl.BlockSpec((1, th), lambda i, h: (0, h)),    # b1 tile over H
                pl.BlockSpec((th, Dp), lambda i, h: (h, 0)),   # W2 tile over H
                pl.BlockSpec((1, Dp), lambda i, h: (0, 0)),    # b2
            ],
            out_specs=pl.BlockSpec((tm, Dp), lambda i, h: (i, 0)),
            scratch_shapes=[pltpu.VMEM((tm, Dp), jnp.float32)],
        ),
        compiler_params=pltpu.CompilerParams(
            dimension_semantics=("parallel", "arbitrary"),
            vmem_limit_bytes=vmem_bytes),
        cost_estimate=cost,
    )(x_p, w1_p, b1_p, w2_p, b2_p)

    return out_p[:M, :D]


if __name__ == "__main__":
    # Small shapes consistent with the module: batch=2, seq=8, n_embed=32.
    batch, seq, n_embed = 2, 8, 32
    hidden = 4 * n_embed

    key = jax.random.PRNGKey(0)
    kx, kw1, kb1, kw2, kb2 = jax.random.split(key, 5)

    x = jax.random.normal(kx, (batch, seq, n_embed), dtype=jnp.float32)

    # Deterministic parameter init (uniform, matching PyTorch Linear init bounds).
    bound1 = 1.0 / (n_embed ** 0.5)
    bound2 = 1.0 / (hidden ** 0.5)
    w1 = jax.random.uniform(kw1, (n_embed, hidden), jnp.float32, -bound1, bound1)
    b1 = jax.random.uniform(kb1, (hidden,), jnp.float32, -bound1, bound1)
    w2 = jax.random.uniform(kw2, (hidden, n_embed), jnp.float32, -bound2, bound2)
    b2 = jax.random.uniform(kb2, (n_embed,), jnp.float32, -bound2, bound2)

    x2d = x.reshape(batch * seq, n_embed)          # (M, D) = (16, 32)
    out2d = expert_forward(x2d, w1, b1, w2, b2)
    out = out2d.reshape(batch, seq, n_embed)
    jax.block_until_ready(out)

    # Pure-JAX f32 reference check (looser tolerance: bf16 MXU operands).
    ref = jnp.maximum(x2d @ w1 + b1, 0.0) @ w2 + b2
    err = float(jnp.max(jnp.abs(out2d - ref)))
    assert err < 5e-2, f"mismatch vs reference: max abs err {err}"

    print("KERNEL_OK")
</pallas_src>

<mosaic_0001>
module attributes {stable_mosaic.version = 11 : i64} {
  func.func @expert_kernel(%arg0: i32, %arg1: i32, %arg2: memref<128x128xbf16, #tpu.memory_space<vmem>>, %arg3: memref<128x128xbf16, #tpu.memory_space<vmem>>, %arg4: memref<1x128xf32, #tpu.memory_space<vmem>>, %arg5: memref<128x128xbf16, #tpu.memory_space<vmem>>, %arg6: memref<1x128xf32, #tpu.memory_space<vmem>>, %arg7: memref<128x128xf32, #tpu.memory_space<vmem>>, %arg8: memref<128x128xf32, #tpu.memory_space<vmem>>) attributes {dimension_semantics = [#tpu.dimension_semantics<parallel>, #tpu.dimension_semantics<arbitrary>], iteration_bounds = array<i64: 1, 1>, scalar_prefetch = 0 : i64, scratch_operands = 1 : i64, tpu.core_type = #tpu.core_type<tc>, window_params = [{transform_indices = @transform_0, window_bounds = array<i64: 128, 128>}, {transform_indices = @transform_1, window_bounds = array<i64: 128, 128>}, {transform_indices = @transform_2, window_bounds = array<i64: 1, 128>}, {transform_indices = @transform_3, window_bounds = array<i64: 128, 128>}, {pipeline_mode = #tpu.pipeline_mode<synchronous>, transform_indices = @transform_4, window_bounds = array<i64: 1, 128>}, {transform_indices = @transform_5, window_bounds = array<i64: 128, 128>}]} {
    %c0_i32 = arith.constant 0 : i32
    %0 = arith.cmpi eq, %arg1, %c0_i32 : i32
    %1 = arith.extui %0 : i1 to i32
    %c0_i32_0 = arith.constant 0 : i32
    %2 = arith.cmpi ne, %1, %c0_i32_0 : i32
    scf.if %2 {
      %cst_16 = arith.constant 0.000000e+00 : f32
      %20 = vector.broadcast %cst_16 : f32 to vector<128x128xf32>
      %c0_17 = arith.constant 0 : index
      %c0_18 = arith.constant 0 : index
      %21 = vector.load %arg8[%c0_17, %c0_18] : memref<128x128xf32, #tpu.memory_space<vmem>>, vector<128x128xf32>
      tpu.vector_store %arg8[%c0_17, %c0_18], %20 {strides = array<i32>} : memref<128x128xf32, #tpu.memory_space<vmem>>, vector<128x128xf32>,
    } else {
    }
    %c0 = arith.constant 0 : index
    %c0_1 = arith.constant 0 : index
    %3 = vector.load %arg2[%c0, %c0_1] : memref<128x128xbf16, #tpu.memory_space<vmem>>, vector<128x128xbf16>
    %c0_2 = arith.constant 0 : index
    %c0_3 = arith.constant 0 : index
    %4 = vector.load %arg3[%c0_2, %c0_3] : memref<128x128xbf16, #tpu.memory_space<vmem>>, vector<128x128xbf16>
    %cst = arith.constant dense<0.000000e+00> : vector<128x128xf32>
    %5 = tpu.matmul %3, %4, %cst {dimension_numbers = #tpu.dot_dimension_numbers<[1], [0], [0], [1], [0, 0, 1, 1], [], []>} : vector<128x128xbf16>, vector<128x128xbf16>, vector<128x128xf32> -> vector<128x128xf32>
    %c0_4 = arith.constant 0 : index
    %c0_5 = arith.constant 0 : index
    %6 = vector.load %arg4[%c0_4, %c0_5] : memref<1x128xf32, #tpu.memory_space<vmem>>, vector<1x128xf32>
    %7 = vector.broadcast %6 : vector<1x128xf32> to vector<128x128xf32>
    %8 = arith.addf %5, %7 : vector<128x128xf32>
    %cst_6 = arith.constant 0.000000e+00 : f32
    %9 = vector.broadcast %cst_6 : f32 to vector<128x128xf32>
    %10 = arith.maximumf %8, %9 : vector<128x128xf32>
    %c0_7 = arith.constant 0 : index
    %c0_8 = arith.constant 0 : index
    %11 = vector.load %arg8[%c0_7, %c0_8] : memref<128x128xf32, #tpu.memory_space<vmem>>, vector<128x128xf32>
    %12 = arith.truncf %10 : vector<128x128xf32> to vector<128x128xbf16>
    %c0_9 = arith.constant 0 : index
    %c0_10 = arith.constant 0 : index
    %13 = vector.load %arg5[%c0_9, %c0_10] : memref<128x128xbf16, #tpu.memory_space<vmem>>, vector<128x128xbf16>
    %cst_11 = arith.constant dense<0.000000e+00> : vector<128x128xf32>
    %14 = tpu.matmul %12, %13, %cst_11 {dimension_numbers = #tpu.dot_dimension_numbers<[1], [0], [0], [1], [0, 0, 1, 1], [], []>} : vector<128x128xbf16>, vector<128x128xbf16>, vector<128x128xf32> -> vector<128x128xf32>
    %15 = arith.addf %11, %14 : vector<128x128xf32>
    %c0_12 = arith.constant 0 : index
    %c0_13 = arith.constant 0 : index
    %16 = vector.load %arg8[%c0_12, %c0_13] : memref<128x128xf32, #tpu.memory_space<vmem>>, vector<128x128xf32>
    tpu.vector_store %arg8[%c0_12, %c0_13], %15 {strides = array<i32>} : memref<128x128xf32, #tpu.memory_space<vmem>>, vector<128x128xf32>,
    %c0_i32_14 = arith.constant 0 : i32
    %17 = arith.cmpi eq, %arg1, %c0_i32_14 : i32
    %18 = arith.extui %17 : i1 to i32
    %c0_i32_15 = arith.constant 0 : i32
    %19 = arith.cmpi ne, %18, %c0_i32_15 : i32
    scf.if %19 {
      %c0_16 = arith.constant 0 : index
      %c0_17 = arith.constant 0 : index
      %20 = vector.load %arg8[%c0_16, %c0_17] : memref<128x128xf32, #tpu.memory_space<vmem>>, vector<128x128xf32>
      %c0_18 = arith.constant 0 : index
      %c0_19 = arith.constant 0 : index
      %21 = vector.load %arg6[%c0_18, %c0_19] : memref<1x128xf32, #tpu.memory_space<vmem>>, vector<1x128xf32>
      %22 = vector.broadcast %21 : vector<1x128xf32> to vector<128x128xf32>
      %23 = arith.addf %20, %22 : vector<128x128xf32>
      %c0_20 = arith.constant 0 : index
      %c0_21 = arith.constant 0 : index
      %24 = vector.load %arg7[%c0_20, %c0_21] : memref<128x128xf32, #tpu.memory_space<vmem>>, vector<128x128xf32>
      tpu.vector_store %arg7[%c0_20, %c0_21], %23 {strides = array<i32>} : memref<128x128xf32, #tpu.memory_space<vmem>>, vector<128x128xf32>,
    } else {
    }
    return
  }
  func.func @transform_0(%arg0: i32, %arg1: i32) -> (i32, i32) {
    %c0_i32 = arith.constant 0 : i32
    %c0_i32_0 = arith.constant 0 : i32
    return %arg0, %c0_i32 : i32, i32
  }
  func.func @transform_1(%arg0: i32, %arg1: i32) -> (i32, i32) {
    %c0_i32 = arith.constant 0 : i32
    %c0_i32_0 = arith.constant 0 : i32
    return %c0_i32, %arg1 : i32, i32
  }
  func.func @transform_2(%arg0: i32, %arg1: i32) -> (i32, i32) {
    %c0_i32 = arith.constant 0 : i32
    %c0_i32_0 = arith.constant 0 : i32
    return %c0_i32, %arg1 : i32, i32
  }
  func.func @transform_3(%arg0: i32, %arg1: i32) -> (i32, i32) {
    %c0_i32 = arith.constant 0 : i32
    %c0_i32_0 = arith.constant 0 : i32
    return %arg1, %c0_i32 : i32, i32
  }
  func.func @transform_4(%arg0: i32, %arg1: i32) -> (i32, i32) {
    %c0_i32 = arith.constant 0 : i32
    %c0_i32_0 = arith.constant 0 : i32
    %c0_i32_1 = arith.constant 0 : i32
    return %c0_i32, %c0_i32_0 : i32, i32
  }
  func.func @transform_5(%arg0: i32, %arg1: i32) -> (i32, i32) {
    %c0_i32 = arith.constant 0 : i32
    %c0_i32_0 = arith.constant 0 : i32
    return %arg0, %c0_i32 : i32, i32
  }
}

</mosaic_0001>

<bundles_post_ra>
// kernel: tpu_custom_call.1
= control target key start
LH: loop header
LB: loop body
LE: loop exit
PB: predicated region body
PF: predicated region fallthrough
CT: control target
= control target key end

     0   :  { %10 = vsyncpa [#allocation4], 0  ;;  %s920_s0 = inlined_call_operand.hbm [shape: bf16[128,128], index: 0, kind: input, shape index: {}]   ;;  %s921_s1 = inlined_call_operand.hbm [shape: bf16[128,128], index: 1, kind: input, shape index: {}]   ;;  %s922_s2 = inlined_call_operand.vmem [shape: f32[1,128], index: 2, kind: input, shape index: {}]   ;;  %s923_s3 = inlined_call_operand.hbm [shape: bf16[128,128], index: 3, kind: input, shape index: {}]   ;;  %s924_s4 = inlined_call_operand.vmem [shape: f32[1,128], index: 4, kind: input, shape index: {}]   ;;  %s925_s5 = inlined_call_operand.hbm [shape: f32[128,128], index: 5, kind: output, shape index: {}]  }
   0x1   :  { %11 = vsyncpa [#allocation7], 0 }
   0x2   :  { %12 = vsyncpa [#allocation5], 0  ;;  %s864_s18 = smov [#allocation6]   ;;  %s865_s20 = smov [#allocation3]  }
   0x3   :  { %s30_s19 = sshll.u32 %s864_s18, 4  ;;  %s18_s21 = sshll.u32 %s865_s20, 4  ;;  %s31_s19 = int_to_ptr.vmem [resolvable:$true] %s30_s19  ;;  %s19_s21 = int_to_ptr.vmem [resolvable:$true] %s18_s21 }
   0x4   :  { %s786_s22 = scalar_lea.vmem %s31_s19, 1024  ;;  %p791_p1 = scmp.lt.s32.totalorder %s31_s19, %s31_s19 }
   0x5   :  { %p787_p0 = scmp.ne.s32.totalorder %s31_s19, %s786_s22  ;;  %p792_p2 = scmp.lt.s32.totalorder %s786_s22, %s786_s22 }
   0x7   :  { %p793_p3 = por %p792_p2, %p791_p1 }
   0x9   :  { %p794_p4 = pnand %p793_p3, %p787_p0 }
   0xb   :  { %797 = shalt.err (!%p794_p4)
}
   0xc   :  { %s866_s23 = smov 64   ;;  %s867_s24 = smov 4  }
   0xd   :  { %36 = dma.hbm_to_vmem [thread:$0]  %s921_s1, 1024, %s31_s19, [#allocation7], %s866_s23, %s866_s23, %s867_s24  }
   0xe   :  { %s806_s27 = scalar_lea.vmem %s19_s21, 1024  ;;  %p811_p6 = scmp.lt.s32.totalorder %s19_s21, %s19_s21 }
   0xf   :  { %p807_p5 = scmp.ne.s32.totalorder %s19_s21, %s806_s27  ;;  %p812_p7 = scmp.lt.s32.totalorder %s806_s27, %s806_s27 }
  0x11   :  { %p813_p8 = por %p812_p7, %p811_p6 }
  0x13   :  { %p814_p9 = pnand %p813_p8, %p807_p5 }
  0x15   :  { %817 = shalt.err (!%p814_p9)
}
  0x16   :  { %24 = dma.hbm_to_vmem [thread:$0]  %s920_s0, 1024, %s19_s21, [#allocation4], %s866_s23, %s866_s23, %s867_s24  }
  0x17   :  { %s868_s30 = smov [#allocation8]  }
  0x18   :  { %s44_s6 = sshll.u32 %s868_s30, 4  ;;  %s45_s6 = int_to_ptr.vmem [resolvable:$true] %s44_s6 }
  0x19   :  { %s826_s7 = scalar_lea.vmem %s45_s6, 1024  ;;  %p831_p11 = scmp.lt.s32.totalorder %s45_s6, %s45_s6 }
  0x1a   :  { %p827_p10 = scmp.ne.s32.totalorder %s45_s6, %s826_s7  ;;  %p832_p12 = scmp.lt.s32.totalorder %s826_s7, %s826_s7 }
  0x1c   :  { %p833_p13 = por %p832_p12, %p831_p11 }
  0x1e   :  { %p834_p0 = pnand %p833_p13, %p827_p10 }
  0x20   :  { %837 = shalt.err (!%p834_p0)
}
  0x21   :  { %50 = dma.hbm_to_vmem [thread:$0]  %s923_s3, 1024, %s45_s6, [#allocation7], %s866_s23, %s866_s23, %s867_s24  }
  0x22   :  { %858 = dma.done.wait [#allocation4], 1024  }
  0x23   :  { %859 = vsyncadd [#allocation4], 4294966272 }
  0x24   :  { %860 = dma.done.wait [#allocation7], 2048  }
  0x25   :  { %861 = vsyncadd [#allocation7], 4294965248  ;;  %v754_v0 = vld [vmem:[#allocation6 + $0x38] sm:$0xff]   ;;  %v755_v1 = vld [vmem:[#allocation6 + $0x30] sm:$0xff]  }
  0x26   :  { %682 = vmatprep.subr.bf16.mxu0 %v754_v0  ;;  %v756_v2 = vld [vmem:[#allocation6 + $0x28] sm:$0xff]   ;;  %v757_v3 = vld [vmem:[#allocation6 + $0x20] sm:$0xff]   ;;  %v758_v5 = vld [vmem:[#allocation6 + $0x18] sm:$0xff]  }
  0x27   :  { %683 = vmatpush3.bf16.msra.mxu0 %v754_v0  ;;  %v762_v4 = vld [vmem:[#allocation3] sm:$0xff]   ;;  %v759_v6 = vld [vmem:[#allocation6 + $0x10] sm:$0xff]   ;;  %v770_v7 = vld [vmem:[#allocation8 + $0x38] sm:$0xff]  }
  0x28   :  { %684 = vmatprep.subr.bf16.mxu0 %v755_v1  ;;  %698 = vmatprep.mubr.bf16.mxu0 %v762_v4  ;;  %v771_v8 = vld [vmem:[#allocation8 + $0x30] sm:$0xff]   ;;  %v760_v9 = vld [vmem:[#allocation6 + $0x8] sm:$0xff]   ;;  %v761_v11 = vld [vmem:[#allocation6] sm:$0xff]  }
  0x29   :  { %714 = vmatprep.subr.bf16.mxu1 %v770_v7  ;;  %v772_v10 = vld [vmem:[#allocation8 + $0x28] sm:$0xff]   ;;  %v773_v12 = vld [vmem:[#allocation8 + $0x20] sm:$0xff]   ;;  %v774_v13 = vld [vmem:[#allocation8 + $0x18] sm:$0xff]  }
  0x2a   :  { %715 = vmatpush3.bf16.msra.mxu1 %v770_v7  ;;  %v763_v14 = vld [vmem:[#allocation3 + $0x8] sm:$0xff]   ;;  %v764_v15 = vld [vmem:[#allocation3 + $0x10] sm:$0xff]   ;;  %v765_v16 = vld [vmem:[#allocation3 + $0x18] sm:$0xff]  }
  0x2b   :  { %685 = vmatpush3.bf16.msra.mxu0 %v755_v1  ;;  %716 = vmatprep.subr.bf16.mxu1 %v771_v8  ;;  %v766_v17 = vld [vmem:[#allocation3 + $0x20] sm:$0xff]   ;;  %v767_v18 = vld [vmem:[#allocation3 + $0x28] sm:$0xff]   ;;  %v768_v19 = vld [vmem:[#allocation3 + $0x30] sm:$0xff]  }
  0x2c   :  { %686 = vmatprep.subr.bf16.mxu0 %v756_v2  ;;  %v769_v20 = vld [vmem:[#allocation3 + $0x38] sm:$0xff]   ;;  %v775_v21 = vld [vmem:[#allocation8 + $0x10] sm:$0xff]   ;;  %v776_v22 = vld [vmem:[#allocation8 + $0x8] sm:$0xff]  }
  0x2d   :  { %v777_v23 = vld [vmem:[#allocation8] sm:$0xff]  }
  0x2e   :  { %717 = vmatpush3.bf16.msra.mxu1 %v771_v8  ;;  %v624_v26 = vld [vmem:[%s922_s2] ss:$0 sm:$0xff] }
  0x2f   :  { %687 = vmatpush3.bf16.msra.mxu0 %v756_v2  ;;  %718 = vmatprep.subr.bf16.mxu1 %v772_v10 }
  0x30   :  { %688 = vmatprep.subr.bf16.mxu0 %v757_v3 }
  0x32   :  { %719 = vmatpush3.bf16.msra.mxu1 %v772_v10 }
  0x33   :  { %689 = vmatpush3.bf16.msra.mxu0 %v757_v3  ;;  %720 = vmatprep.subr.bf16.mxu1 %v773_v12 }
  0x34   :  { %690 = vmatprep.subr.bf16.mxu0 %v758_v5 }
  0x36   :  { %721 = vmatpush3.bf16.msra.mxu1 %v773_v12 }
  0x37   :  { %691 = vmatpush3.bf16.msra.mxu0 %v758_v5  ;;  %722 = vmatprep.subr.bf16.mxu1 %v774_v13 }
  0x38   :  { %692 = vmatprep.subr.bf16.mxu0 %v759_v6 }
  0x3a   :  { %723 = vmatpush3.bf16.msra.mxu1 %v774_v13 }
  0x3b   :  { %693 = vmatpush3.bf16.msra.mxu0 %v759_v6  ;;  %724 = vmatprep.subr.bf16.mxu1 %v775_v21 }
  0x3c   :  { %694 = vmatprep.subr.bf16.mxu0 %v760_v9 }
  0x3e   :  { %725 = vmatpush3.bf16.msra.mxu1 %v775_v21 }
  0x3f   :  { %695 = vmatpush3.bf16.msra.mxu0 %v760_v9  ;;  %726 = vmatprep.subr.bf16.mxu1 %v776_v22 }
  0x40   :  { %696 = vmatprep.subr.bf16.mxu0 %v761_v11 }
  0x42   :  { %727 = vmatpush3.bf16.msra.mxu1 %v776_v22 }
  0x43   :  { %697 = vmatpush3.bf16.msra.mxu0 %v761_v11  ;;  %728 = vmatprep.subr.bf16.mxu1 %v777_v23 }
  0x46   :  { %699 = vmatmul.mubr.bf16.vlgmr.msra.gmra.mxu0 %v763_v14  ;;  %729 = vmatpush3.bf16.msra.mxu1 %v777_v23 }
  0x47   :  { %702 = vmatprep.mubr.bf16.mxu0 %v764_v15 }
  0x4e   :  { %703 = vmatmul.mubr.bf16.gmra.mxu0 %v765_v16 }
  0x4f   :  { %706 = vmatprep.mubr.bf16.mxu0 %v766_v17  ;;  %v649_v17 = vld [vmem:[%s924_s4] ss:$0 sm:$0xff]  ;;  %s869_s4 = smov [#allocation9]  }
  0x50   :  { %s611_s10 = sshll.u32 %s869_s4, 4  ;;  %s612_s10 = int_to_ptr.vmem [resolvable:$true] %s611_s10 }
  0x51   :  { %s838_s11 = scalar_lea.vmem %s612_s10, 2048  ;;  %p843_p2 = scmp.lt.s32.totalorder %s612_s10, %s612_s10 }
  0x52   :  { %p839_p1 = scmp.ne.s32.totalorder %s612_s10, %s838_s11  ;;  %p844_p3 = scmp.lt.s32.totalorder %s838_s11, %s838_s11 }
  0x54   :  { %p845_p4 = por %p844_p3, %p843_p2 }
  0x56   :  { %707 = vmatmul.mubr.bf16.gmra.mxu0 %v767_v18  ;;  %p846_p5 = pnand %p845_p4, %p839_p1 }
  0x57   :  { %710 = vmatprep.mubr.bf16.mxu0 %v768_v19 }
  0x5e   :  { %711 = vmatmul.mubr.bf16.gmra.mxu0 %v769_v20 }
 0x106   :  { %v700_v24 = vpop.f32.mrf.mxu0 }
 0x107   :  { %v261_v30 = vadd.f32 %v700_v24, %v624_v26 }
 0x108   :  { %v252_v25 = vpop.f32.mrf.mxu0 }
 0x109   :  { %v253_v28 = vadd.f32 %v624_v26, %v252_v25  ;;  %v317_v37 = vmax.f32 %v261_v30, 0.0 }
 0x10a   :  { %v701_v27 = vpop.f32.mrf.mxu0 }
 0x10b   :  { %v264_v29 = vadd.f32 %v701_v27, %v624_v26  ;;  %v315_v35 = vmax.f32 %v253_v28, 0.0 }
 0x10c   :  { %v255_v31 = vpop.f32.mrf.mxu0 }
 0x10d   :  { %v256_v32 = vadd.f32 %v624_v26, %v255_v31  ;;  %v318_v33 = vmax.f32 %v264_v29, 0.0 }
 0x10e   :  { %v704_v34 = vpop.f32.mrf.mxu0 }
 0x10f   :  { %v316_v36 = vmax.f32 %v256_v32, 0.0  ;;  %v348_v40 = vpack.c.bf16 %v318_v33, %v317_v37  ;;  %v277_v44 = vadd.f32 %v704_v34, %v624_v26 }
 0x110   :  { %v268_v38 = vpop.f32.mrf.mxu0 }
 0x111   :  { %v347_v39 = vpack.c.bf16 %v316_v36, %v315_v35  ;;  %v269_v42 = vadd.f32 %v624_v26, %v268_v38  ;;  %v321_v51 = vmax.f32 %v277_v44, 0.0 }
 0x112   :  { %v705_v41 = vpop.f32.mrf.mxu0 }
 0x113   :  { %v280_v43 = vadd.f32 %v705_v41, %v624_v26  ;;  %730 = vmatprep.mubr.bf16.mxu1 %v347_v39  ;;  %v319_v49 = vmax.f32 %v269_v42, 0.0 }
 0x114   :  { %v271_v45 = vpop.f32.mrf.mxu0  ;;  %731 = vmatmul.mubr.bf16.vlgmr.msra.gmra.mxu1 %v348_v40 }
 0x115   :  { %v272_v46 = vadd.f32 %v624_v26, %v271_v45  ;;  %v322_v47 = vmax.f32 %v280_v43, 0.0 }
 0x116   :  { %v708_v48 = vpop.f32.mrf.mxu0 }
 0x117   :  { %v320_v50 = vmax.f32 %v272_v46, 0.0  ;;  %v350_v54 = vpack.c.bf16 %v322_v47, %v321_v51  ;;  %v293_v58 = vadd.f32 %v708_v48, %v624_v26 }
 0x118   :  { %v284_v52 = vpop.f32.mrf.mxu0 }
 0x119   :  { %v349_v53 = vpack.c.bf16 %v320_v50, %v319_v49  ;;  %v285_v56 = vadd.f32 %v624_v26, %v284_v52  ;;  %v325_v1 = vmax.f32 %v293_v58, 0.0 }
 0x11a   :  { %v709_v55 = vpop.f32.mrf.mxu0 }
 0x11b   :  { %v296_v57 = vadd.f32 %v709_v55, %v624_v26  ;;  %734 = vmatprep.mubr.bf16.mxu1 %v349_v53  ;;  %v323_v63 = vmax.f32 %v285_v56, 0.0 }
 0x11c   :  { %v287_v59 = vpop.f32.mrf.mxu0  ;;  %735 = vmatmul.mubr.bf16.gmra.mxu1 %v350_v54 }
 0x11d   :  { %v288_v60 = vadd.f32 %v624_v26, %v287_v59  ;;  %v326_v61 = vmax.f32 %v296_v57, 0.0 }
 0x11e   :  { %v712_v62 = vpop.f32.mrf.mxu0 }
 0x11f   :  { %v324_v0 = vmax.f32 %v288_v60, 0.0  ;;  %v352_v4 = vpack.c.bf16 %v326_v61, %v325_v1  ;;  %v309_v8 = vadd.f32 %v712_v62, %v624_v26 }
 0x120   :  { %v300_v2 = vpop.f32.mrf.mxu0 }
 0x121   :  { %v351_v3 = vpack.c.bf16 %v324_v0, %v323_v63  ;;  %v301_v6 = vadd.f32 %v624_v26, %v300_v2  ;;  %v329_v14 = vmax.f32 %v309_v8, 0.0 }
 0x122   :  { %v713_v5 = vpop.f32.mrf.mxu0 }
 0x123   :  { %v312_v7 = vadd.f32 %v713_v5, %v624_v26  ;;  %738 = vmatprep.mubr.bf16.mxu1 %v351_v3  ;;  %v327_v12 = vmax.f32 %v301_v6, 0.0 }
 0x124   :  { %v303_v9 = vpop.f32.mrf.mxu0  ;;  %739 = vmatmul.mubr.bf16.gmra.mxu1 %v352_v4 }
 0x125   :  { %v304_v10 = vadd.f32 %v624_v26, %v303_v9  ;;  %v330_v11 = vmax.f32 %v312_v7, 0.0 }
 0x127   :  { %v328_v13 = vmax.f32 %v304_v10, 0.0  ;;  %v354_v16 = vpack.c.bf16 %v330_v11, %v329_v14 }
 0x129   :  { %v353_v15 = vpack.c.bf16 %v328_v13, %v327_v12 }
 0x12b   :  { %742 = vmatprep.mubr.bf16.mxu1 %v353_v15 }
 0x12c   :  { %743 = vmatmul.mubr.bf16.gmra.mxu1 %v354_v16 }
 0x1d4   :  { %v732_v18 = vpop.f32.mrf.mxu1 }
 0x1d5   :  { %v576_v19 = vadd.f32 %v732_v18, %v649_v17 }
 0x1d6   :  { %v453_v20 = vpop.f32.mrf.mxu1 }
 0x1d7   :  { %592 = vst [vmem:[#allocation9 + $0x10] sm:$0xff] %v576_v19  ;;  %v574_v21 = vadd.f32 %v649_v17, %v453_v20 }
 0x1d8   :  { %v733_v22 = vpop.f32.mrf.mxu1 }
 0x1d9   :  { %590 = vst [vmem:[#allocation9] sm:$0xff] %v574_v21  ;;  %v577_v23 = vadd.f32 %v733_v22, %v649_v17 }
 0x1da   :  { %v456_v24 = vpop.f32.mrf.mxu1 }
 0x1db   :  { %593 = vst [vmem:[#allocation9 + $0x18] sm:$0xff] %v577_v23  ;;  %v575_v25 = vadd.f32 %v649_v17, %v456_v24 }
 0x1dc   :  { %v736_v26 = vpop.f32.mrf.mxu1 }
 0x1dd   :  { %591 = vst [vmem:[#allocation9 + $0x8] sm:$0xff] %v575_v25  ;;  %v580_v27 = vadd.f32 %v736_v26, %v649_v17 }
 0x1de   :  { %v469_v28 = vpop.f32.mrf.mxu1 }
 0x1df   :  { %596 = vst [vmem:[#allocation9 + $0x30] sm:$0xff] %v580_v27  ;;  %v578_v29 = vadd.f32 %v649_v17, %v469_v28 }
 0x1e0   :  { %v737_v30 = vpop.f32.mrf.mxu1 }
 0x1e1   :  { %594 = vst [vmem:[#allocation9 + $0x20] sm:$0xff] %v578_v29  ;;  %v581_v31 = vadd.f32 %v737_v30, %v649_v17 }
 0x1e2   :  { %v472_v32 = vpop.f32.mrf.mxu1 }
 0x1e3   :  { %597 = vst [vmem:[#allocation9 + $0x38] sm:$0xff] %v581_v31  ;;  %v579_v33 = vadd.f32 %v649_v17, %v472_v32 }
 0x1e4   :  { %v740_v34 = vpop.f32.mrf.mxu1 }
 0x1e5   :  { %595 = vst [vmem:[#allocation9 + $0x28] sm:$0xff] %v579_v33  ;;  %v584_v35 = vadd.f32 %v740_v34, %v649_v17 }
 0x1e6   :  { %v485_v36 = vpop.f32.mrf.mxu1 }
 0x1e7   :  { %600 = vst [vmem:[#allocation9 + $0x50] sm:$0xff] %v584_v35  ;;  %v582_v37 = vadd.f32 %v649_v17, %v485_v36 }
 0x1e8   :  { %v741_v38 = vpop.f32.mrf.mxu1 }
 0x1e9   :  { %598 = vst [vmem:[#allocation9 + $0x40] sm:$0xff] %v582_v37  ;;  %v585_v39 = vadd.f32 %v741_v38, %v649_v17 }
 0x1ea   :  { %v488_v40 = vpop.f32.mrf.mxu1 }
 0x1eb   :  { %601 = vst [vmem:[#allocation9 + $0x58] sm:$0xff] %v585_v39  ;;  %v583_v41 = vadd.f32 %v649_v17, %v488_v40 }
 0x1ec   :  { %v744_v42 = vpop.f32.mrf.mxu1 }
 0x1ed   :  { %599 = vst [vmem:[#allocation9 + $0x48] sm:$0xff] %v583_v41  ;;  %v588_v43 = vadd.f32 %v744_v42, %v649_v17 }
 0x1ee   :  { %v501_v44 = vpop.f32.mrf.mxu1 }
 0x1ef   :  { %604 = vst [vmem:[#allocation9 + $0x70] sm:$0xff] %v588_v43  ;;  %v586_v45 = vadd.f32 %v649_v17, %v501_v44 }
 0x1f0   :  { %v745_v46 = vpop.f32.mrf.mxu1 }
 0x1f1   :  { %602 = vst [vmem:[#allocation9 + $0x60] sm:$0xff] %v586_v45  ;;  %v589_v47 = vadd.f32 %v745_v46, %v649_v17 }
 0x1f2   :  { %v504_v48 = vpop.f32.mrf.mxu1 }
 0x1f3   :  { %605 = vst [vmem:[#allocation9 + $0x78] sm:$0xff] %v589_v47  ;;  %v587_v49 = vadd.f32 %v649_v17, %v504_v48 }
 0x1f5   :  { %603 = vst [vmem:[#allocation9 + $0x68] sm:$0xff] %v587_v49 }
 0x1f6   :  { %849 = shalt.err (!%p846_p5)
}
 0x1f7   :  { %s870_s12 = smov 128   ;;  %s871_s13 = smov 8  }
 0x1f8   :  { %617 = dma.vmem_to_hbm [thread:$0]  %s612_s10, 2048, %s925_s5, [#allocation5], %s870_s12, %s870_s12, %s871_s13  }
 0x1f9   :  { %862 = dma.done.wait [#allocation5], 2048  }
 0x1fa   :  { %863 = vsyncadd [#allocation5], 4294965248 }
 0x1fb   :  { %621 = vsyncpa [#allocation4], 1 }
 0x1fc   :  { %622 = vsyncpa [#allocation7], 1 }
 0x1fd   :  { %623 = vsyncpa [#allocation5], 1 }

</bundles_post_ra>
